<compile_context>
chip_gen: v6e
topology: v6e:2x2x1
jax: 0.10.0
libtpu: 0.0.40
codegen_flags: <defaults>
</compile_context>

<pallas_src>
import functools

import jax
import jax.numpy as jnp
from jax.experimental import pallas as pl
from jax.experimental.pallas import tpu as pltpu


def _qnorm_kernel(x_ref, alpha_ref, bias_ref, o_ref, *, eps, size):
    # Upcast once after load; all elementwise math in f32 (correctness for bf16,
    # and v5e VPU/EUP has no bf16 path anyway).
    x = x_ref[...].astype(jnp.float32)          # (tm, d_model)

    r = x[:, 0 * size:1 * size]
    i = x[:, 1 * size:2 * size]
    j = x[:, 2 * size:3 * size]
    k = x[:, 3 * size:4 * size]

    # rsqrt goes to the EUP (separate VLIW slot) -> keeps VALU free.
    inv = jax.lax.rsqrt(r * r + i * i + j * j + k * k + eps)

    alpha = alpha_ref[...].astype(jnp.float32)  # (1, size), broadcasts over rows
    bias = bias_ref[...].astype(jnp.float32)    # (1, size)

    # Direct slice stores: no concatenated (tm, d_model) temporary.
    o_ref[:, 0 * size:1 * size] = (alpha * (r * inv) + bias).astype(o_ref.dtype)
    o_ref[:, 1 * size:2 * size] = (alpha * (i * inv) + bias).astype(o_ref.dtype)
    o_ref[:, 2 * size:3 * size] = (alpha * (j * inv) + bias).astype(o_ref.dtype)
    o_ref[:, 3 * size:4 * size] = (alpha * (k * inv) + bias).astype(o_ref.dtype)


def _choose_row_tile(n_rows, d_model, dtype_bytes,
                     target_block_bytes=4 << 20, max_rows=1024):
    """Pick a row tile so one (tm, d_model) block is ~target_block_bytes."""
    if n_rows <= 32:
        # Tiny problem: one block covering the full row extent (legal block shape).
        return n_rows
    rows = max(1, target_block_bytes // max(1, d_model * dtype_bytes))
    rows = min(rows, max_rows, n_rows)
    # Round to a multiple of 32: sublane-friendly for f32 (8), bf16 (16), int8 (32).
    rows = max(32, (rows // 32) * 32)
    return rows


def quaternion_norm(x, alpha, bias, eps=1e-6):
    """Pallas TPU implementation of the `Norm` module forward pass.

    x:     (..., d_model) with d_model divisible by 4
    alpha: (d_model // 4,)
    bias:  (d_model // 4,)
    """
    orig_shape = x.shape
    d_model = orig_shape[-1]
    size = d_model // 4
    assert d_model == 4 * size, "d_model must be divisible by 4"

    x2 = x.reshape(-1, d_model)
    n_rows = x2.shape[0]
    dtype_bytes = jnp.dtype(x2.dtype).itemsize

    tm = _choose_row_tile(n_rows, d_model, dtype_bytes)
    grid = (pl.cdiv(n_rows, tm),)   # ragged last block handled by Pallas (masked)

    alpha2 = alpha.reshape(1, size)
    bias2 = bias.reshape(1, size)

    # Double-buffered input + output blocks, plus a little headroom / params.
    pipeline_bytes = 4 * tm * d_model * dtype_bytes + 2 * size * 4
    vmem_limit = min(max(pipeline_bytes + (8 << 20), 32 << 20), 48 << 20)

    out = pl.pallas_call(
        functools.partial(_qnorm_kernel, eps=eps, size=size),
        out_shape=jax.ShapeDtypeStruct((n_rows, d_model), x2.dtype),
        grid_spec=pltpu.PrefetchScalarGridSpec(
            num_scalar_prefetch=0,
            grid=grid,
            in_specs=[
                pl.BlockSpec((tm, d_model), lambda r: (r, 0)),
                pl.BlockSpec((1, size), lambda r: (0, 0)),
                pl.BlockSpec((1, size), lambda r: (0, 0)),
            ],
            out_specs=pl.BlockSpec((tm, d_model), lambda r: (r, 0)),
        ),
        compiler_params=pltpu.CompilerParams(
            dimension_semantics=("parallel",),
            vmem_limit_bytes=vmem_limit,
        ),
    )(x2, alpha2, bias2)

    return out.reshape(orig_shape)


def quaternion_norm_ref(x, alpha, bias, eps=1e-6):
    """Pure-JAX reference mirroring the PyTorch forward (f32 math)."""
    size = x.shape[-1] // 4
    xf = x.astype(jnp.float32)
    r, i, j, k = jnp.split(xf, 4, axis=-1)
    qn = jnp.sqrt(r * r + i * i + j * j + k * k + eps)
    r, i, j, k = r / qn, i / qn, j / qn, k / qn
    out = jnp.concatenate(
        [alpha * r + bias, alpha * i + bias, alpha * j + bias, alpha * k + bias],
        axis=-1)
    return out.astype(x.dtype)


if __name__ == "__main__":
    key = jax.random.PRNGKey(0)
    batch, seq, d_model = 2, 8, 32
    size = d_model // 4

    x = jax.random.normal(key, (batch, seq, d_model), dtype=jnp.float32)
    # Matches nn.Parameter(torch.ones(size)) / nn.Parameter(torch.zeros(size)).
    alpha = jnp.ones((size,), dtype=jnp.float32)
    bias = jnp.zeros((size,), dtype=jnp.float32)

    out = quaternion_norm(x, alpha, bias, eps=1e-6)
    out = jax.block_until_ready(out)

    ref = quaternion_norm_ref(x, alpha, bias, eps=1e-6)
    assert out.shape == (batch, seq, d_model)
    assert jnp.allclose(out, ref, atol=1e-5, rtol=1e-5), "mismatch vs reference"

    print("KERNEL_OK")
</pallas_src>

<mosaic_0001>
module attributes {stable_mosaic.version = 11 : i64} {
  func.func @_qnorm_kernel(%arg0: i32, %arg1: memref<16x32xf32, #tpu.memory_space<vmem>>, %arg2: memref<1x8xf32, #tpu.memory_space<vmem>>, %arg3: memref<1x8xf32, #tpu.memory_space<vmem>>, %arg4: memref<16x32xf32, #tpu.memory_space<vmem>>) attributes {dimension_semantics = [#tpu.dimension_semantics<parallel>], iteration_bounds = array<i64: 1>, scalar_prefetch = 0 : i64, scratch_operands = 0 : i64, tpu.core_type = #tpu.core_type<tc>, window_params = [{transform_indices = @transform_0, window_bounds = array<i64: 16, 32>}, {pipeline_mode = #tpu.pipeline_mode<synchronous>, transform_indices = @transform_1, window_bounds = array<i64: 1, 8>}, {pipeline_mode = #tpu.pipeline_mode<synchronous>, transform_indices = @transform_2, window_bounds = array<i64: 1, 8>}, {transform_indices = @transform_3, window_bounds = array<i64: 16, 32>}]} {
    %c0 = arith.constant 0 : index
    %c0_0 = arith.constant 0 : index
    %0 = vector.load %arg1[%c0, %c0_0] : memref<16x32xf32, #tpu.memory_space<vmem>>, vector<16x32xf32>
    %1 = vector.extract_strided_slice %0 {offsets = [0, 0], sizes = [16, 8], strides = [1, 1]} : vector<16x32xf32> to vector<16x8xf32>
    %2 = vector.extract_strided_slice %0 {offsets = [0, 8], sizes = [16, 8], strides = [1, 1]} : vector<16x32xf32> to vector<16x8xf32>
    %3 = vector.extract_strided_slice %0 {offsets = [0, 16], sizes = [16, 8], strides = [1, 1]} : vector<16x32xf32> to vector<16x8xf32>
    %4 = vector.extract_strided_slice %0 {offsets = [0, 24], sizes = [16, 8], strides = [1, 1]} : vector<16x32xf32> to vector<16x8xf32>
    %5 = arith.mulf %1, %1 : vector<16x8xf32>
    %6 = arith.mulf %2, %2 : vector<16x8xf32>
    %7 = arith.addf %5, %6 : vector<16x8xf32>
    %8 = arith.mulf %3, %3 : vector<16x8xf32>
    %9 = arith.addf %7, %8 : vector<16x8xf32>
    %10 = arith.mulf %4, %4 : vector<16x8xf32>
    %11 = arith.addf %9, %10 : vector<16x8xf32>
    %cst = arith.constant 9.99999997E-7 : f32
    %12 = vector.broadcast %cst : f32 to vector<16x8xf32>
    %13 = arith.addf %11, %12 : vector<16x8xf32>
    %14 = math.rsqrt %13 : vector<16x8xf32>
    %c0_1 = arith.constant 0 : index
    %c0_2 = arith.constant 0 : index
    %15 = vector.load %arg2[%c0_1, %c0_2] : memref<1x8xf32, #tpu.memory_space<vmem>>, vector<1x8xf32>
    %c0_3 = arith.constant 0 : index
    %c0_4 = arith.constant 0 : index
    %16 = vector.load %arg3[%c0_3, %c0_4] : memref<1x8xf32, #tpu.memory_space<vmem>>, vector<1x8xf32>
    %17 = arith.mulf %1, %14 : vector<16x8xf32>
    %18 = vector.broadcast %15 : vector<1x8xf32> to vector<16x8xf32>
    %19 = arith.mulf %18, %17 : vector<16x8xf32>
    %20 = vector.broadcast %16 : vector<1x8xf32> to vector<16x8xf32>
    %21 = arith.addf %19, %20 : vector<16x8xf32>
    %c0_5 = arith.constant 0 : index
    %c0_6 = arith.constant 0 : index
    %22 = vector.load %arg4[%c0_5, %c0_6] : memref<16x32xf32, #tpu.memory_space<vmem>>, vector<16x8xf32>
    tpu.vector_store %arg4[%c0_5, %c0_6], %21 {strides = array<i32>} : memref<16x32xf32, #tpu.memory_space<vmem>>, vector<16x8xf32>,
    %23 = arith.mulf %2, %14 : vector<16x8xf32>
    %24 = vector.broadcast %15 : vector<1x8xf32> to vector<16x8xf32>
    %25 = arith.mulf %24, %23 : vector<16x8xf32>
    %26 = vector.broadcast %16 : vector<1x8xf32> to vector<16x8xf32>
    %27 = arith.addf %25, %26 : vector<16x8xf32>
    %c0_7 = arith.constant 0 : index
    %c8 = arith.constant 8 : index
    %28 = vector.load %arg4[%c0_7, %c8] : memref<16x32xf32, #tpu.memory_space<vmem>>, vector<16x8xf32>
    tpu.vector_store %arg4[%c0_7, %c8], %27 {strides = array<i32>} : memref<16x32xf32, #tpu.memory_space<vmem>>, vector<16x8xf32>,
    %29 = arith.mulf %3, %14 : vector<16x8xf32>
    %30 = vector.broadcast %15 : vector<1x8xf32> to vector<16x8xf32>
    %31 = arith.mulf %30, %29 : vector<16x8xf32>
    %32 = vector.broadcast %16 : vector<1x8xf32> to vector<16x8xf32>
    %33 = arith.addf %31, %32 : vector<16x8xf32>
    %c0_8 = arith.constant 0 : index
    %c16 = arith.constant 16 : index
    %34 = vector.load %arg4[%c0_8, %c16] : memref<16x32xf32, #tpu.memory_space<vmem>>, vector<16x8xf32>
    tpu.vector_store %arg4[%c0_8, %c16], %33 {strides = array<i32>} : memref<16x32xf32, #tpu.memory_space<vmem>>, vector<16x8xf32>,
    %35 = arith.mulf %4, %14 : vector<16x8xf32>
    %36 = vector.broadcast %15 : vector<1x8xf32> to vector<16x8xf32>
    %37 = arith.mulf %36, %35 : vector<16x8xf32>
    %38 = vector.broadcast %16 : vector<1x8xf32> to vector<16x8xf32>
    %39 = arith.addf %37, %38 : vector<16x8xf32>
    %c0_9 = arith.constant 0 : index
    %c24 = arith.constant 24 : index
    %40 = vector.load %arg4[%c0_9, %c24] : memref<16x32xf32, #tpu.memory_space<vmem>>, vector<16x8xf32>
    tpu.vector_store %arg4[%c0_9, %c24], %39 {strides = array<i32>} : memref<16x32xf32, #tpu.memory_space<vmem>>, vector<16x8xf32>,
    return
  }
  func.func @transform_0(%arg0: i32) -> (i32, i32) {
    %c0_i32 = arith.constant 0 : i32
    %c0_i32_0 = arith.constant 0 : i32
    return %arg0, %c0_i32 : i32, i32
  }
  func.func @transform_1(%arg0: i32) -> (i32, i32) {
    %c0_i32 = arith.constant 0 : i32
    %c0_i32_0 = arith.constant 0 : i32
    %c0_i32_1 = arith.constant 0 : i32
    return %c0_i32, %c0_i32_0 : i32, i32
  }
  func.func @transform_2(%arg0: i32) -> (i32, i32) {
    %c0_i32 = arith.constant 0 : i32
    %c0_i32_0 = arith.constant 0 : i32
    %c0_i32_1 = arith.constant 0 : i32
    return %c0_i32, %c0_i32_0 : i32, i32
  }
  func.func @transform_3(%arg0: i32) -> (i32, i32) {
    %c0_i32 = arith.constant 0 : i32
    %c0_i32_0 = arith.constant 0 : i32
    return %arg0, %c0_i32 : i32, i32
  }
}

</mosaic_0001>

<bundles_post_ra>
// kernel: tpu_custom_call.1
= control target key start
LH: loop header
LB: loop body
LE: loop exit
PB: predicated region body
PF: predicated region fallthrough
CT: control target
= control target key end

     0   :  { %8 = vsyncpa [#allocation3], 0  ;;  %s336_s0 = inlined_call_operand.hbm [shape: f32[16,32], index: 0, kind: input, shape index: {}]   ;;  %s337_s1 = inlined_call_operand.vmem [shape: f32[1,8], index: 1, kind: input, shape index: {}]   ;;  %s338_s2 = inlined_call_operand.vmem [shape: f32[1,8], index: 2, kind: input, shape index: {}]   ;;  %s339_s3 = inlined_call_operand.hbm [shape: f32[16,32], index: 3, kind: output, shape index: {}]  }
   0x1   :  { %9 = vsyncpa [#allocation4], 0  ;;  %s257_s12 = smov [#allocation2]  }
   0x2   :  { %s15_s13 = sshll.u32 %s257_s12, 4  ;;  %s16_s13 = int_to_ptr.vmem [resolvable:$true] %s15_s13 }
   0x3   :  { %s221_s14 = scalar_lea.vmem %s16_s13, 256  ;;  %p226_p1 = scmp.lt.s32.totalorder %s16_s13, %s16_s13 }
   0x4   :  { %p222_p0 = scmp.ne.s32.totalorder %s16_s13, %s221_s14  ;;  %p227_p2 = scmp.lt.s32.totalorder %s221_s14, %s221_s14 }
   0x6   :  { %p228_p3 = por %p227_p2, %p226_p1 }
   0x8   :  { %p229_p4 = pnand %p228_p3, %p222_p0 }
   0xa   :  { %232 = shalt.err (!%p229_p4)
}
   0xb   :  { %s258_s15 = smov 128   ;;  %s259_s16 = smov 8  }
   0xc   :  { %21 = dma.hbm_to_vmem [thread:$0]  %s336_s0, 256, %s16_s13, [#allocation3], %s258_s15, %s258_s15, %s259_s16  }
   0xd   :  { %253 = dma.done.wait [#allocation3], 256  }
   0xe   :  { %254 = vsyncadd [#allocation3], 4294967040  ;;  %v292_v0 = vld [vmem:[#allocation2] sm:$0xff]  ;;  %v30_v1 = vld [vmem:[#allocation2 + $0x8] sm:$0xff]  ;;  %s260_s19 = smov 112   ;;  %s261_s20 = smov 120  }
   0xf   :  { %v31_v2 = vmul.f32 %v292_v0, %v292_v0  ;;  %v32_v3 = vmul.f32 %v30_v1, %v30_v1  ;;  %s262_s0 = smov 104   ;;  %v198_v19 = vld [vmem:[%s337_s1] ss:$0 sm:$0xff]  ;;  %vm83_vm0 = vcmask 64512   ;;  %s263_s25 = smov 16   ;;  %vm116_vm1 = vcmask 130112  }
  0x10   :  { %v199_v22 = vld [vmem:[%s338_s2] ss:$0 sm:$0xff]  ;;  %s264_s1 = smov 24   ;;  %vm147_vm2 = vcmask 195712   ;;  %s265_s2 = smov [#allocation5]   ;;  %vm178_vm3 = vcmask 261312  }
  0x11   :  { %43 = vrot.lane.b32.xlu1 %v31_v2, %s260_s19  ;;  %35 = vrot.lane.b32.xlu0 %v31_v2, %s261_s20  ;;  %s186_s26 = sshll.u32 %s265_s2, 4  ;;  %s187_s26 = int_to_ptr.vmem [resolvable:$true] %s186_s26 }
  0x12   :  { %s233_s27 = scalar_lea.vmem %s187_s26, 256  ;;  %p238_p6 = scmp.lt.s32.totalorder %s187_s26, %s187_s26 }
  0x13   :  { %p234_p5 = scmp.ne.s32.totalorder %s187_s26, %s233_s27  ;;  %p239_p7 = scmp.lt.s32.totalorder %s233_s27, %s233_s27 }
  0x15   :  { %45 = vrot.lane.b32.xlu1 %v32_v3, %s260_s19  ;;  %37 = vrot.lane.b32.xlu0 %v32_v3, %s261_s20  ;;  %p240_p8 = por %p239_p7, %p238_p6 }
  0x17   :  { %p241_p9 = pnand %p240_p8, %p234_p5 }
  0x19   :  { %53 = vrot.lane.b32.xlu1 %v32_v3, %s262_s0  ;;  %51 = vrot.lane.b32.xlu0 %v31_v2, %s262_s0 }
  0x83   :  { %v44_v4 = vpop.permute.xlu1 %43  ;;  %v36_v5 = vpop.permute.xlu0 %35 }
  0x84   :  { %v41_v6 = vadd.f32 %v36_v5, %v31_v2 }
  0x86   :  { %v49_v11 = vadd.f32 %v44_v4, %v41_v6 }
  0x87   :  { %v46_v7 = vpop.permute.xlu1 %45  ;;  %v38_v8 = vpop.permute.xlu0 %37 }
  0x88   :  { %v42_v9 = vadd.f32 %v38_v8, %v32_v3 }
  0x8a   :  { %v50_v10 = vadd.f32 %v46_v7, %v42_v9 }
  0x8b   :  { %v54_v12 = vpop.permute.xlu1 %53  ;;  %v52_v13 = vpop.permute.xlu0 %51 }
  0x8c   :  { %v58_v14 = vadd.f32 %v54_v12, %v50_v10  ;;  %v57_v15 = vadd.f32 %v52_v13, %v49_v11 }
  0x8e   :  { %v60_v16 = vadd.f32 1e-06, %v58_v14  ;;  %v59_v17 = vadd.f32 1e-06, %v57_v15 }
  0x90   :  { %209 = vrsqrt.f32 %v60_v16 }
  0x91   :  { %211 = vrsqrt.f32 %v59_v17 }
  0x9d   :  { %v210_v18 = vpop.eup %209 }
  0x9e   :  { %v212_v20 = vpop.eup %211  ;;  %90 = vrot.lane.b32.xlu1 %v210_v18, %s259_s16  ;;  %v66_v21 = vmul.f32 %v210_v18, %v30_v1 }
  0x9f   :  { %88 = vrot.lane.b32.xlu0 %v212_v20, %s259_s16  ;;  %v65_v23 = vmul.f32 %v212_v20, %v292_v0 }
  0xa0   :  { %v74_v24 = vmul.f32 %v198_v19, %v66_v21 }
  0xa1   :  { %v73_v25 = vmul.f32 %v198_v19, %v65_v23 }
  0xa2   :  { %121 = vrot.lane.b32.xlu1 %v210_v18, %s263_s25  ;;  %v82_v26 = vadd.f32 %v199_v22, %v74_v24 }
  0xa3   :  { %119 = vrot.lane.b32.xlu0 %v212_v20, %s263_s25  ;;  %v81_v27 = vadd.f32 %v199_v22, %v73_v25 }
  0xa4   :  { %85 = vst.msk [vmem:[#allocation5 + $0x8] sm:$0xff] %vm83_vm0, %v82_v26 }
  0xa5   :  { %84 = vst.msk [vmem:[#allocation5] sm:$0xff] %vm83_vm0, %v81_v27 }
  0xa6   :  { %152 = vrot.lane.b32.xlu1 %v210_v18, %s264_s1 }
  0xa7   :  { %150 = vrot.lane.b32.xlu0 %v212_v20, %s264_s1 }
 0x110   :  { %v91_v28 = vpop.permute.xlu1 %90 }
 0x111   :  { %v95_v29 = vmul.f32 %v91_v28, %v30_v1  ;;  %v89_v30 = vpop.permute.xlu0 %88 }
 0x112   :  { %v94_v31 = vmul.f32 %v89_v30, %v292_v0 }
 0x113   :  { %100 = vrot.lane.b32.xlu1 %v95_v29, %s261_s20 }
 0x114   :  { %98 = vrot.lane.b32.xlu0 %v94_v31, %s261_s20  ;;  %v122_v32 = vpop.permute.xlu1 %121 }
 0x115   :  { %v126_v33 = vmul.f32 %v122_v32, %v30_v1  ;;  %v120_v34 = vpop.permute.xlu0 %119 }
 0x116   :  { %v125_v35 = vmul.f32 %v120_v34, %v292_v0 }
 0x117   :  { %131 = vrot.lane.b32.xlu1 %v126_v33, %s260_s19 }
 0x118   :  { %129 = vrot.lane.b32.xlu0 %v125_v35, %s260_s19  ;;  %v153_v36 = vpop.permute.xlu1 %152 }
 0x119   :  { %v157_v37 = vmul.f32 %v153_v36, %v30_v1  ;;  %v151_v38 = vpop.permute.xlu0 %150 }
 0x11a   :  { %v156_v39 = vmul.f32 %v151_v38, %v292_v0 }
 0x11b   :  { %162 = vrot.lane.b32.xlu1 %v157_v37, %s262_s0 }
 0x11c   :  { %160 = vrot.lane.b32.xlu0 %v156_v39, %s262_s0 }
 0x185   :  { %v101_v40 = vpop.permute.xlu1 %100 }
 0x186   :  { %v105_v41 = vmul.f32 %v198_v19, %v101_v40  ;;  %v99_v42 = vpop.permute.xlu0 %98 }
 0x187   :  { %v104_v43 = vmul.f32 %v198_v19, %v99_v42 }
 0x188   :  { %v107_v44 = vadd.f32 %v199_v22, %v105_v41 }
 0x189   :  { %v132_v45 = vpop.permute.xlu1 %131  ;;  %v106_v46 = vadd.f32 %v199_v22, %v104_v43 }
 0x18a   :  { %v136_v47 = vmul.f32 %v198_v19, %v132_v45  ;;  %v130_v48 = vpop.permute.xlu0 %129  ;;  %112 = vrot.lane.b32.xlu1 %v107_v44, %s259_s16 }
 0x18b   :  { %v135_v49 = vmul.f32 %v198_v19, %v130_v48  ;;  %110 = vrot.lane.b32.xlu0 %v106_v46, %s259_s16 }
 0x18c   :  { %v138_v50 = vadd.f32 %v199_v22, %v136_v47 }
 0x18d   :  { %v137_v51 = vadd.f32 %v199_v22, %v135_v49  ;;  %v163_v52 = vpop.permute.xlu1 %162 }
 0x18e   :  { %v167_v53 = vmul.f32 %v198_v19, %v163_v52  ;;  %v161_v54 = vpop.permute.xlu0 %160  ;;  %143 = vrot.lane.b32.xlu1 %v138_v50, %s263_s25 }
 0x18f   :  { %v166_v55 = vmul.f32 %v198_v19, %v161_v54  ;;  %141 = vrot.lane.b32.xlu0 %v137_v51, %s263_s25 }
 0x190   :  { %v169_v56 = vadd.f32 %v199_v22, %v167_v53 }
 0x191   :  { %v168_v57 = vadd.f32 %v199_v22, %v166_v55 }
 0x192   :  { %174 = vrot.lane.b32.xlu1 %v169_v56, %s264_s1 }
 0x193   :  { %172 = vrot.lane.b32.xlu0 %v168_v57, %s264_s1 }
 0x1fc   :  { %v113_v58 = vpop.permute.xlu1 %112 }
 0x1fd   :  { %118 = vst.msk [vmem:[#allocation5 + $0x8] sm:$0xff] %vm116_vm1, %v113_v58  ;;  %v111_v59 = vpop.permute.xlu0 %110 }
 0x1fe   :  { %117 = vst.msk [vmem:[#allocation5] sm:$0xff] %vm116_vm1, %v111_v59 }
 0x200   :  { %v144_v60 = vpop.permute.xlu1 %143 }
 0x201   :  { %149 = vst.msk [vmem:[#allocation5 + $0x8] sm:$0xff] %vm147_vm2, %v144_v60  ;;  %v142_v61 = vpop.permute.xlu0 %141 }
 0x202   :  { %148 = vst.msk [vmem:[#allocation5] sm:$0xff] %vm147_vm2, %v142_v61 }
 0x204   :  { %v175_v62 = vpop.permute.xlu1 %174 }
 0x205   :  { %v173_v63 = vpop.permute.xlu0 %172  ;;  %180 = vst.msk [vmem:[#allocation5 + $0x8] sm:$0xff] %vm178_vm3, %v175_v62 }
 0x206   :  { %179 = vst.msk [vmem:[#allocation5] sm:$0xff] %vm178_vm3, %v173_v63 }
 0x207   :  { %244 = shalt.err (!%p241_p9)
}
 0x208   :  { %192 = dma.vmem_to_hbm [thread:$0]  %s187_s26, 256, %s339_s3, [#allocation4], %s258_s15, %s258_s15, %s259_s16  }
 0x209   :  { %255 = dma.done.wait [#allocation4], 256  }
 0x20a   :  { %256 = vsyncadd [#allocation4], 4294967040 }
 0x20b   :  { %196 = vsyncpa [#allocation3], 1 }
 0x20c   :  { %197 = vsyncpa [#allocation4], 1 }

</bundles_post_ra>
